<compile_context>
chip_gen: v7x
topology: tpu7x:2x2x1
jax: 0.10.0
libtpu: 0.0.40
codegen_flags: <defaults>
</compile_context>

<pallas_src>
import functools

import jax
import jax.numpy as jnp
from jax import lax
from jax.experimental import pallas as pl
from jax.experimental.pallas import tpu as pltpu


def _round_up(v, m):
    return (v + m - 1) // m * m


def _sublane_multiple(dtype):
    return {4: 8, 2: 16, 1: 32}.get(jnp.dtype(dtype).itemsize, 8)


def _vmem_capacity_bytes():
    try:
        return int(pltpu.get_tpu_info().vmem_capacity_bytes)
    except Exception:
        return 64 << 20  # conservative fallback (valid on v5e/v6e/v7x)


def _commentwise_kernel(x_ref, w_ref, b_ref, o_ref, xsum_ref, *,
                        seq_len, seq_eff, seq_tile, has_remainder):
    """Grid = (batch tiles [parallel], sequence chunks [arbitrary]).

    xsum_ref: [bt, 8, H_eff] f32 sublane-shaped running sum of the x stream.
    """
    k = pl.program_id(1)

    @pl.when(k == 0)
    def _init():
        xsum_ref[...] = jnp.zeros_like(xsum_ref)

    x = x_ref[...].astype(jnp.float32)                      # [bt, ts, He]
    bt, ts, he = x.shape

    if has_remainder:
        # Mask out-of-range rows of the (padded) last sequence chunk.
        start = k * seq_tile
        row = lax.broadcasted_iota(jnp.int32, x.shape, 1)
        x = jnp.where(row + start < seq_eff, x, 0.0)

    if ts % 8 == 0:
        # vreg-aligned split: summing over axis 1 adds whole vregs (pure VALU);
        # the 8-sublane cross-lane reduce is deferred to the finalize step.
        xsum_ref[...] += jnp.sum(x.reshape(bt, ts // 8, 8, he), axis=1)
    else:
        xsum_ref[:, 0:1, :] += jnp.sum(x, axis=1, keepdims=True)

    @pl.when(k == pl.num_programs(1) - 1)
    def _finalize():
        total = jnp.sum(xsum_ref[...], axis=1)              # [bt, He] one XLU reduce
        mean_x = total * (1.0 / jnp.float32(seq_len))       # divide by ORIGINAL S
        logits = jnp.dot(mean_x, w_ref[...].astype(jnp.float32),
                         preferred_element_type=jnp.float32)  # [bt, O]
        logits = logits + b_ref[...]                        # bias broadcast
        # TODO(synk): training-mode dropout on logits (hp.last_layer_dropout)
        # is not modeled; eval mode is an identity.
        m = jnp.max(logits, axis=-1, keepdims=True)
        shifted = logits - m
        lse = jnp.log(jnp.sum(jnp.exp(shifted), axis=-1, keepdims=True))
        o_ref[...] = (shifted - lse).reshape(o_ref.shape).astype(o_ref.dtype)


def commentwise_sum_log_softmax(x, weight, bias, *, seq_tile=None):
    """x: [B, S, H]; weight: [O, H] (PyTorch Linear layout); bias: [O]."""
    B, S, H = x.shape
    O = weight.shape[0]
    itemsize = jnp.dtype(x.dtype).itemsize
    sub = _sublane_multiple(x.dtype)

    # ---- lane-dense folding: pack 128//H consecutive positions into lanes ----
    fold = 1
    if H < 128 and 128 % H == 0:
        f = 128 // H
        if S % f == 0:
            fold = f
    H_eff = H * fold
    S_eff = S // fold
    x_eff = x.reshape(B, S_eff, H_eff) if fold > 1 else x   # row-major: free reshape

    w_t = weight.T.astype(jnp.float32)                       # [H, O]
    # Vertically tile the weight so the folded [*, H_eff] sum multiplies back
    # to the original H->O projection in a single matmul.
    w_eff = jnp.tile(w_t, (fold, 1)) if fold > 1 else w_t    # [H_eff, O]
    b2 = bias.astype(jnp.float32).reshape(1, O)

    bt = 1  # batch-shard granularity: one row per grid step (megacore-friendly)

    # ---- generation-aware, padding-aware VMEM budget ----
    cap = _vmem_capacity_bytes()
    lane_h = _round_up(H_eff, 128)
    x_row_bytes = bt * lane_h * itemsize                     # one padded seq row

    if seq_tile is None:
        budget_x = (cap * 45) // 100                         # ~45% VMEM for x stream
        seq_tile = budget_x // (2 * x_row_bytes)             # 2 = double buffer
    seq_tile = int(seq_tile)
    if seq_tile >= S_eff:
        seq_tile = S_eff                                     # full axis: always legal
    else:
        seq_tile = max(sub, (seq_tile // sub) * sub)         # dense sublane packing

    num_k = -(-S_eff // seq_tile)                            # cdiv
    has_remainder = (S_eff % seq_tile) != 0

    # Padded VMEM accounting (2x buffers for every auto-pipelined spec).
    # NOTE: weight/bias are grid-invariant but still get 2 buffers by default;
    # they are counted here so big H*O can't silently overshoot the limit.
    x_blk = 2 * bt * _round_up(seq_tile, sub) * lane_h * itemsize
    w_blk = 2 * _round_up(H_eff, 8) * _round_up(O, 128) * 4
    b_blk = 2 * 8 * _round_up(O, 128) * 4
    o_blk = 2 * bt * 8 * _round_up(O, 128) * 4
    acc_blk = bt * 8 * lane_h * 4
    vmem_needed = x_blk + w_blk + b_blk + o_blk + acc_blk
    vmem_limit = min(max(vmem_needed * 5 // 4 + (4 << 20), 32 << 20),
                     (cap * 7) // 8)

    kernel = functools.partial(
        _commentwise_kernel, seq_len=S, seq_eff=S_eff, seq_tile=seq_tile,
        has_remainder=has_remainder)

    out = pl.pallas_call(
        kernel,
        out_shape=jax.ShapeDtypeStruct((B, 1, O), jnp.float32),
        grid_spec=pltpu.PrefetchScalarGridSpec(
            num_scalar_prefetch=0,
            grid=(B // bt, num_k),
            in_specs=[
                pl.BlockSpec((bt, seq_tile, H_eff), lambda b, k: (b, k, 0)),  # x chunk
                pl.BlockSpec((H_eff, O), lambda b, k: (0, 0)),                # weight
                pl.BlockSpec((1, O), lambda b, k: (0, 0)),                    # bias
            ],
            out_specs=pl.BlockSpec((bt, 1, O), lambda b, k: (b, 0, 0)),
            scratch_shapes=[pltpu.VMEM((bt, 8, H_eff), jnp.float32)],
        ),
        compiler_params=pltpu.CompilerParams(
            dimension_semantics=("parallel", "arbitrary"),
            vmem_limit_bytes=int(vmem_limit),
        ),
    )(x_eff, w_eff, b2)
    return out.reshape(B, O)


def _reference(x, weight, bias):
    logits = jnp.einsum("bsh,oh->bso", x, weight) + bias[None, None, :]
    logits = jnp.sum(logits, axis=1) / x.shape[1]
    return jax.nn.log_softmax(logits, axis=-1)


if __name__ == "__main__":
    key = jax.random.PRNGKey(0)
    B, S, H, O = 2, 16, 32, 4   # batch, seq, hidden_size, output_size

    kx, kw, kb = jax.random.split(key, 3)
    x = jax.random.normal(kx, (B, S, H), dtype=jnp.float32)

    # Deterministic nn.Linear-style init: U(-1/sqrt(H), 1/sqrt(H))
    bound = 1.0 / (H ** 0.5)
    weight = jax.random.uniform(kw, (O, H), minval=-bound, maxval=bound,
                                dtype=jnp.float32)
    bias = jax.random.uniform(kb, (O,), minval=-bound, maxval=bound,
                              dtype=jnp.float32)

    out = commentwise_sum_log_softmax(x, weight, bias)
    out = jax.block_until_ready(out)

    ref = _reference(x, weight, bias)
    assert out.shape == (B, O)
    assert jnp.allclose(out, ref, atol=1e-5, rtol=1e-5), (out, ref)

    print("KERNEL_OK")
</pallas_src>

<mosaic_0001>
module attributes {stable_mosaic.version = 11 : i64} {
  func.func @_commentwise_kernel(%arg0: i32, %arg1: i32, %arg2: memref<1x4x128xf32, #tpu.memory_space<vmem>>, %arg3: memref<128x4xf32, #tpu.memory_space<vmem>>, %arg4: memref<1x4xf32, #tpu.memory_space<vmem>>, %arg5: memref<1x1x4xf32, #tpu.memory_space<vmem>>, %arg6: memref<1x8x128xf32, #tpu.memory_space<vmem>>) attributes {dimension_semantics = [#tpu.dimension_semantics<parallel>, #tpu.dimension_semantics<arbitrary>], iteration_bounds = array<i64: 2, 1>, scalar_prefetch = 0 : i64, scratch_operands = 1 : i64, tpu.core_type = #tpu.core_type<tc>, window_params = [{transform_indices = @transform_0, window_bounds = array<i64: 1, 4, 128>}, {pipeline_mode = #tpu.pipeline_mode<synchronous>, transform_indices = @transform_1, window_bounds = array<i64: 128, 4>}, {pipeline_mode = #tpu.pipeline_mode<synchronous>, transform_indices = @transform_2, window_bounds = array<i64: 1, 4>}, {transform_indices = @transform_3, window_bounds = array<i64: 1, 1, 4>}]} {
    %c0_i32 = arith.constant 0 : i32
    %0 = arith.cmpi eq, %arg1, %c0_i32 : i32
    %1 = arith.extui %0 : i1 to i32
    %c0_i32_0 = arith.constant 0 : i32
    %2 = arith.cmpi ne, %1, %c0_i32_0 : i32
    scf.if %2 {
      %cst_11 = arith.constant 0.000000e+00 : f32
      %12 = vector.broadcast %cst_11 : f32 to vector<1x8x128xf32>
      %c0_12 = arith.constant 0 : index
      %c0_13 = arith.constant 0 : index
      %c0_14 = arith.constant 0 : index
      %13 = vector.load %arg6[%c0_12, %c0_13, %c0_14] : memref<1x8x128xf32, #tpu.memory_space<vmem>>, vector<1x8x128xf32>
      tpu.vector_store %arg6[%c0_12, %c0_13, %c0_14], %12 {strides = array<i32>} : memref<1x8x128xf32, #tpu.memory_space<vmem>>, vector<1x8x128xf32>,
    } else {
    }
    %c0 = arith.constant 0 : index
    %c0_1 = arith.constant 0 : index
    %c0_2 = arith.constant 0 : index
    %3 = vector.load %arg2[%c0, %c0_1, %c0_2] : memref<1x4x128xf32, #tpu.memory_space<vmem>>, vector<1x4x128xf32>
    %c0_3 = arith.constant 0 : index
    %c0_4 = arith.constant 0 : index
    %c0_5 = arith.constant 0 : index
    %4 = vector.load %arg6[%c0_3, %c0_4, %c0_5] : memref<1x8x128xf32, #tpu.memory_space<vmem>>, vector<1x1x128xf32>
    %cst = arith.constant dense<0.000000e+00> : vector<1x128xf32>
    %5 = vector.multi_reduction <add>, %3, %cst [1] : vector<1x4x128xf32> to vector<1x128xf32>
    %6 = vector.shape_cast %5 : vector<1x128xf32> to vector<1x1x128xf32>
    %7 = arith.addf %4, %6 : vector<1x1x128xf32>
    %c0_6 = arith.constant 0 : index
    %c0_7 = arith.constant 0 : index
    %c0_8 = arith.constant 0 : index
    %8 = vector.load %arg6[%c0_6, %c0_7, %c0_8] : memref<1x8x128xf32, #tpu.memory_space<vmem>>, vector<1x1x128xf32>
    tpu.vector_store %arg6[%c0_6, %c0_7, %c0_8], %7 {strides = array<i32>} : memref<1x8x128xf32, #tpu.memory_space<vmem>>, vector<1x1x128xf32>,
    %c0_i32_9 = arith.constant 0 : i32
    %9 = arith.cmpi eq, %arg1, %c0_i32_9 : i32
    %10 = arith.extui %9 : i1 to i32
    %c0_i32_10 = arith.constant 0 : i32
    %11 = arith.cmpi ne, %10, %c0_i32_10 : i32
    scf.if %11 {
      %c0_11 = arith.constant 0 : index
      %c0_12 = arith.constant 0 : index
      %c0_13 = arith.constant 0 : index
      %12 = vector.load %arg6[%c0_11, %c0_12, %c0_13] : memref<1x8x128xf32, #tpu.memory_space<vmem>>, vector<1x8x128xf32>
      %cst_14 = arith.constant dense<0.000000e+00> : vector<1x128xf32>
      %13 = vector.multi_reduction <add>, %12, %cst_14 [1] : vector<1x8x128xf32> to vector<1x128xf32>
      %cst_15 = arith.constant 1.000000e+00 : f32
      %cst_16 = arith.constant 1.600000e+01 : f32
      %14 = arith.divf %cst_15, %cst_16 : f32
      %15 = vector.broadcast %14 : f32 to vector<1x128xf32>
      %16 = arith.mulf %13, %15 : vector<1x128xf32>
      %c0_17 = arith.constant 0 : index
      %c0_18 = arith.constant 0 : index
      %17 = vector.load %arg3[%c0_17, %c0_18] : memref<128x4xf32, #tpu.memory_space<vmem>>, vector<128x4xf32>
      %cst_19 = arith.constant dense<0.000000e+00> : vector<1x4xf32>
      %18 = tpu.matmul %16, %17, %cst_19 {dimension_numbers = #tpu.dot_dimension_numbers<[1], [0], [0], [1], [0, 0, 1, 1], [], []>} : vector<1x128xf32>, vector<128x4xf32>, vector<1x4xf32> -> vector<1x4xf32>
      %c0_20 = arith.constant 0 : index
      %c0_21 = arith.constant 0 : index
      %19 = vector.load %arg4[%c0_20, %c0_21] : memref<1x4xf32, #tpu.memory_space<vmem>>, vector<1x4xf32>
      %20 = arith.addf %18, %19 : vector<1x4xf32>
      %cst_22 = arith.constant dense<0xFF800000> : vector<1xf32>
      %21 = vector.multi_reduction <maximumf>, %20, %cst_22 [1] : vector<1x4xf32> to vector<1xf32>
      %22 = vector.shape_cast %21 : vector<1xf32> to vector<1x1xf32>
      %23 = vector.broadcast %22 : vector<1x1xf32> to vector<1x4xf32>
      %24 = arith.subf %20, %23 : vector<1x4xf32>
      %25 = math.exp %24 : vector<1x4xf32>
      %cst_23 = arith.constant dense<0.000000e+00> : vector<1xf32>
      %26 = vector.multi_reduction <add>, %25, %cst_23 [1] : vector<1x4xf32> to vector<1xf32>
      %27 = vector.shape_cast %26 : vector<1xf32> to vector<1x1xf32>
      %28 = math.log %27 : vector<1x1xf32>
      %29 = vector.broadcast %28 : vector<1x1xf32> to vector<1x4xf32>
      %30 = arith.subf %24, %29 : vector<1x4xf32>
      %31 = vector.shape_cast %30 : vector<1x4xf32> to vector<1x1x4xf32>
      %c0_24 = arith.constant 0 : index
      %c0_25 = arith.constant 0 : index
      %c0_26 = arith.constant 0 : index
      %32 = vector.load %arg5[%c0_24, %c0_25, %c0_26] : memref<1x1x4xf32, #tpu.memory_space<vmem>>, vector<1x1x4xf32>
      tpu.vector_store %arg5[%c0_24, %c0_25, %c0_26], %31 {strides = array<i32>} : memref<1x1x4xf32, #tpu.memory_space<vmem>>, vector<1x1x4xf32>,
    } else {
    }
    return
  }
  func.func @transform_0(%arg0: i32, %arg1: i32) -> (i32, i32, i32) {
    %c0_i32 = arith.constant 0 : i32
    %c0_i32_0 = arith.constant 0 : i32
    return %arg0, %arg1, %c0_i32 : i32, i32, i32
  }
  func.func @transform_1(%arg0: i32, %arg1: i32) -> (i32, i32) {
    %c0_i32 = arith.constant 0 : i32
    %c0_i32_0 = arith.constant 0 : i32
    %c0_i32_1 = arith.constant 0 : i32
    return %c0_i32, %c0_i32_0 : i32, i32
  }
  func.func @transform_2(%arg0: i32, %arg1: i32) -> (i32, i32) {
    %c0_i32 = arith.constant 0 : i32
    %c0_i32_0 = arith.constant 0 : i32
    %c0_i32_1 = arith.constant 0 : i32
    return %c0_i32, %c0_i32_0 : i32, i32
  }
  func.func @transform_3(%arg0: i32, %arg1: i32) -> (i32, i32, i32) {
    %c0_i32 = arith.constant 0 : i32
    %c0_i32_0 = arith.constant 0 : i32
    %c0_i32_1 = arith.constant 0 : i32
    return %arg0, %c0_i32, %c0_i32_0 : i32, i32, i32
  }
}

</mosaic_0001>

<bundles_post_ra>
// kernel: tpu_custom_call.1
= control target key start
LH: loop header
LB: loop body
LE: loop exit
PB: predicated region body
PF: predicated region fallthrough
CT: control target
= control target key end

     0   :  { %8 = vsyncpa [#allocation4], 0  ;;  %s813_s0 = inlined_call_operand.vmem [shape: f32[2,4,128], index: 0, kind: input, shape index: {}]   ;;  %s814_s1 = inlined_call_operand.vmem [shape: f32[128,4], index: 1, kind: input, shape index: {}]   ;;  %s815_s2 = inlined_call_operand.vmem [shape: f32[1,4], index: 2, kind: input, shape index: {}]   ;;  %s816_s3 = inlined_call_operand.hbm [shape: f32[2,1,4], index: 3, kind: output, shape index: {}]  }
   0x1   :  { %10 = vsyncpa [#allocation4 + $0x1], 0  ;;  %s647_s12 = smov 0   ;;  %s649_s13 = smov 0  }
   0x2   :  { %s651_s14 = smov 0   ;;  %s653_s15 = smov 0  }
   0x3   :  { %s655_s16 = smov 0   ;;  %s657_s17 = smov 0  }
   0x4 LB: > { %s396_s18 = sadd.s32 4294967295, %s621_s17   ;;  %s397_s19 = sadd.s32 4294967294, %s621_s17   ;;  %s621_s17 = sphi %s657_s17, %s16_s17   ;;  %s617_s16 = sphi %s655_s16, %s823_s16   ;;  %s613_s15 = sphi %s653_s15, %s822_s15   ;;  %s609_s14 = sphi %s651_s14, %s821_s14   ;;  %s605_s13 = sphi %s649_s13, %s820_s13   ;;  %s601_s12 = sphi %s647_s12, %s819_s12  }
   0x5   : > { %s28_s20 = sadd.s32 1, %s617_s16  ;;  %s105_s21 = sadd.s32 1, %s609_s14 }
   0x6   : > { %p30_p0 = scmp.ge.s32.totalorder %s28_s20, 2  ;;  %p115_p1 = scmp.ne.s32.totalorder %s609_s14, %s605_s13 }
   0x7   : > { %p116_p2 = scmp.eq.s32.totalorder %s396_s18, 1  ;;  %p121_p3 = scmp.ne.s32.totalorder %s605_s13, %s601_s12 }
   0x8   : > { %s825_s20 = smov (%p30_p0, %s28_s20), 0  ;;  %p122_p5 = scmp.eq.s32.totalorder %s397_s19, 1 }
   0x9   : > { %p687_p4 = por %p116_p2, %p115_p1  ;;  %s102_s23 = ssub.s32 %s617_s16, %s825_s20 }
   0xa   : > { %p400_p6 = scmp.ge.s32.totalorder %s621_s17, 1  ;;  %p103_p7 = scmp.eq.s32.totalorder %s102_s23, 0 }
   0xb   : > { %p694_p8 = por %p122_p5, %p121_p3  ;;  %p156_p9 = scmp.lt.s32.totalorder %s621_s17, 3 }
   0xc   : > { %s700_s25 = scalar_select %p103_p7, %s609_s14, %s105_s21  }
   0xd   : > { %p157_p10 = pnand %p400_p6, %p156_p9 }
   0xe   : > { %v216_v0 = vld [vmem:[%s814_s1] sm:$0xff] (!%p157_p10)  ;;  %v217_v1 = vld [vmem:[%s814_s1 + $0x8] sm:$0xff] (!%p157_p10)  ;;  %v218_v2 = vld [vmem:[%s814_s1 + $0x10] sm:$0xff] (!%p157_p10)  ;;  %p181_p11 = scmp.lt.s32.totalorder (!%p157_p10), %s613_s15, 1  ;;  %v623_v3 = vmov (!%p157_p10), 0.0|0.0   ;;  %v624_v6 = vmov (!%p157_p10), 0.0  }
   0xf   : > { %160 = sbr.rel (%p157_p10) target bundleno = 608 (0x260), region = 32  ;;  %457 = vmatprep.subr.bf16.mxu0 (!%p157_p10), %v623_v3  ;;  %v458_v4 = vpack.c.bf16 (!%p157_p10), %v217_v1, %v216_v0  ;;  %v219_v5 = vld [vmem:[%s814_s1 + $0x18] sm:$0xff] (!%p157_p10)  ;;  %192 = vst [vmem:[#allocation2] sm:$0xff] (!%p157_p10), %v624_v6  ;;  %vm625_vm0 = vmmov (!%p157_p10), 0   ;;  %v220_v8 = vld [vmem:[%s814_s1 + $0x20] sm:$0xff] (!%p157_p10)  ;;  %v221_v9 = vld [vmem:[%s814_s1 + $0x28] sm:$0xff] (!%p157_p10) }
  0x10   : > { %454 = vmatprep.mubr.msk.f32.mxu0 (!%p157_p10), %vm625_vm0, %v624_v6  ;;  %v461_v7 = vpack.c.bf16 (!%p157_p10), %v219_v5, %v218_v2  ;;  %vm195_vm1 = vcmask (!%p157_p10), 1043456   ;;  %v464_v11 = vpack.c.bf16 (!%p157_p10), %v221_v9, %v220_v8  ;;  %v222_v13 = vld [vmem:[%s814_s1 + $0x30] sm:$0xff] (!%p157_p10)  ;;  %v223_v14 = vld [vmem:[%s814_s1 + $0x38] sm:$0xff] (!%p157_p10)  ;;  %v224_v18 = vld [vmem:[%s814_s1 + $0x40] sm:$0xff] (!%p157_p10)  ;;  %vm303_vm2 = vcmask (!%p157_p10), 24576   ;;  %s179_s4 = sand.u32 (!%p157_p10), 1, %s605_s13  }
  0x11   : > { %459 = vmatpush3.bf16.msra.mxu0 (!%p157_p10), %v458_v4  ;;  %v467_v17 = vpack.c.bf16 (!%p157_p10), %v223_v14, %v222_v13  ;;  %v225_v19 = vld [vmem:[%s814_s1 + $0x48] sm:$0xff] (!%p157_p10)  ;;  %v226_v23 = vld [vmem:[%s814_s1 + $0x50] sm:$0xff] (!%p157_p10)  ;;  %v227_v24 = vld [vmem:[%s814_s1 + $0x58] sm:$0xff] (!%p157_p10)  ;;  %s402_s5 = sshll.u32 (!%p157_p10), %s613_s15, 4  ;;  %s180_s6 = scalar_lea.vmem (!%p157_p10), [#allocation3], %s179_s4 }
  0x12   : > { %460 = vmatprep.subr.bf16.mxu0 (!%p157_p10), %v623_v3  ;;  %v470_v22 = vpack.c.bf16 (!%p157_p10), %v225_v19, %v224_v18  ;;  %v473_v28 = vpack.c.bf16 (!%p157_p10), %v227_v24, %v226_v23  ;;  %v228_v29 = vld [vmem:[%s814_s1 + $0x60] sm:$0xff] (!%p157_p10)  ;;  %v229_v30 = vld [vmem:[%s814_s1 + $0x68] sm:$0xff] (!%p157_p10)  ;;  %v230_v33 = vld [vmem:[%s814_s1 + $0x70] sm:$0xff] (!%p157_p10)  ;;  %s765_s10 = scalar_lea.hbm (!%p157_p10), %s816_s3, %s402_s5  ;;  %s318_s11 = scalar_lea.sflag (!%p157_p10), [#allocation4], %s179_s4 }
  0x13   : > { %v476_v32 = vpack.c.bf16 (!%p157_p10), %v229_v30, %v228_v29  ;;  %v231_v34 = vld [vmem:[%s814_s1 + $0x78] sm:$0xff] (!%p157_p10)  ;;  %v232_v44 = vld [vmem:[%s815_s2] sm:$0x1] (!%p157_p10) }
  0x14   : > { %v479_v35 = vpack.c.bf16 (!%p157_p10), %v231_v34, %v230_v33 }
  0x15   : > { %462 = vmatpush3.bf16.msra.mxu0 (!%p157_p10), %v461_v7 }
  0x16   : > { %s182_s7 = scalar_select %p181_p11, %s613_s15, 1  ;;  %463 = vmatprep.subr.bf16.mxu0 %v623_v3  ;;  %v194_v26 = vld [vmem:[#allocation2] sm:$0x1] }
  0x17   : > { %s626_s15 = smov [#allocation3]  }
  0x18   : > { %s401_s18 = sshll.u32 %s182_s7, 2  ;;  %s330_s7 = sshll.u32 %s180_s6, 4  ;;  %s767_s7 = int_to_ptr.vmem [resolvable:$true] %s330_s7 }
  0x19   : > { %s187_s23 = scalar_lea.vmem %s813_s0, %s401_s18  ;;  %465 = vmatpush3.bf16.msra.mxu0 %v464_v11  ;;  %s543_s18 = scalar_lea.vmem %s767_s7, 16 }
  0x1a   : > { %v193_v10 = vld [vmem:[%s187_s23] sm:$0xf]  ;;  %466 = vmatprep.subr.bf16.mxu0 %v623_v3  ;;  %p544_p12 = scmp.ne.s32.totalorder %s767_s7, %s543_s18  ;;  %s547_s19 = sshll.u32 %s626_s15, 4  ;;  %s548_s19 = int_to_ptr.vmem [resolvable:$false] %s547_s19 }
  0x1b   : > { %v196_v12 = vsel %vm195_vm1, %v193_v10, 0.0  ;;  %s549_s21 = scalar_lea.vmem %s548_s19, 32  ;;  %p550_p1 = scmp.lt.s32.totalorder %s767_s7, %s548_s19 }
  0x1c   : > { %v197_v15 = vrot.slane %v196_v12, 4  ;;  %p545_p13 = pnand %p544_p12, %p687_p4  ;;  %p551_p2 = scmp.lt.s32.totalorder %s549_s21, %s543_s18 }
  0x1d   : > { %468 = vmatpush3.bf16.msra.mxu0 %v467_v17 }
  0x1e   : > { %v198_v16 = vadd.f32 %v197_v15, %v196_v12  ;;  %469 = vmatprep.subr.bf16.mxu0 %v623_v3  ;;  %p546_p0 = pneg %p545_p13  ;;  %p552_p3 = por %p551_p2, %p550_p1 }
  0x20   : > { %v199_v20 = vrot.slane %v198_v16, 2  ;;  %p553_p5 = pnand %p552_p3, %p546_p0 }
  0x21   : > { %471 = vmatpush3.bf16.msra.mxu0 %v470_v22 }
  0x22   : > { %v200_v21 = vadd.f32 %v199_v20, %v198_v16  ;;  %472 = vmatprep.subr.bf16.mxu0 %v623_v3 }
  0x24   : > { %v201_v25 = vrot.slane %v200_v21, 1 }
  0x25   : > { %474 = vmatpush3.bf16.msra.mxu0 %v473_v28 }
  0x26   : > { %v202_v27 = vadd.f32 %v201_v25, %v200_v21  ;;  %475 = vmatprep.subr.bf16.mxu0 %v623_v3 }
  0x28   : > { %v203_v31 = vadd.f32 %v202_v27, %v194_v26 }
  0x29   : > { %477 = vmatpush3.bf16.msra.mxu0 %v476_v32 }
  0x2a   : > { %204 = vst [vmem:[#allocation2] sm:$0x1] %v203_v31  ;;  %478 = vmatprep.subr.bf16.mxu0 %v623_v3 }
  0x2d   : > { %480 = vmatpush3.bf16.msra.mxu0 %v479_v35 }
  0x31   : > { %v208_v36 = vld [vmem:[#allocation2] sm:$0xff] }
  0x32   : > { %v209_v37 = vrot.slane %v208_v36, 4 }
  0x34   : > { %v210_v38 = vadd.f32 %v209_v37, %v208_v36 }
  0x36   : > { %v211_v39 = vrot.slane %v210_v38, 2 }
  0x38   : > { %v212_v40 = vadd.f32 %v211_v39, %v210_v38 }
  0x3a   : > { %v213_v41 = vrot.slane %v212_v40, 1 }
  0x3c   : > { %v214_v42 = vadd.f32 %v213_v41, %v212_v40 }
  0x3e   : > { %v215_v43 = vmul.f32 0.0625, %v214_v42 }
  0x40   : > { %455 = vmatmul.mubr.f32.vlgmr.msra.gmra.mrb[0].mxu0 %v215_v43 }
 0x113   : > { %v299_v45 = vpop.f32.mrb[0].mxu0 }
 0x114   : > { %v300_v46 = vadd.f32 %v299_v45, %v232_v44  ;;  %v456_v47 = vpop.f32.mrb[1].mxu0 }
 0x116   : > { %v304_v48 = vsel %vm303_vm2, %v300_v46, -inf }
 0x117   : > { %305 = vmax.xlane.f32.xlu0 %v304_v48 }
 0x1a4   : > { %v306_v49 = vpop.xlane.xlu0 %305 }
 0x1a5   : > { %v307_v50 = vsub.f32 %v300_v46, %v306_v49 }
 0x1a7   : > { %v308_v51 = vmul.f32 1.442695, %v307_v50 }
 0x1a9   : > { %539 = vpow2.f32 %v308_v51 }
 0x1b3   : > { %v540_v52 = vpop.eup %539 }
 0x1b4   : > { %v310_v53 = vsel %vm303_vm2, %v540_v52, 0.0 }
 0x1b5   : > { %311 = vadd.xlane.f32.xlu0 %v310_v53 }
 0x242   : > { %v312_v54 = vpop.xlane.xlu0 %311 }
 0x243   : > { %541 = vlog2.f32 %v312_v54 }
 0x24d   : > { %v542_v55 = vpop.eup %541 }
 0x24e   : > { %v314_v56 = vmul.f32 0.6931472, %v542_v55 }
 0x250   : > { %v315_v57 = vsub.f32 %v307_v50, %v314_v56 }
 0x252   : > { %316 = vst.msk [vmem:[%s180_s6] sm:$0x1] %vm303_vm2, %v315_v57 }
 0x253   : > { %556 = shalt.err (!%p553_p5)
}
 0x254   : > { %s557_s23 = scalar_lea.hbm %s765_s10, 16  ;;  %s561_s28 = scalar_lea.hbm %s816_s3, 32 }
 0x255   : > { %p558_p6 = scmp.ne.s32.totalorder %s765_s10, %s557_s23  ;;  %p562_p10 = scmp.lt.u32.totalorder %s765_s10, %s816_s3 }
 0x256   : > { %p563_p11 = scmp.lt.u32.totalorder %s561_s28, %s557_s23  ;;  %p565_p13 = scmp.lt.u32.totalorder %s557_s23, %s765_s10 }
 0x257   : > { %p559_p7 = pnand %p558_p6, %p687_p4 }
 0x258   : > { %p564_p12 = por %p563_p11, %p562_p10 }
 0x259   : > { %p560_p9 = pneg %p559_p7 }
 0x25a   : > { %p566_p0 = por %p565_p13, %p564_p12 }
 0x25c   : > { %p567_p1 = pnand %p566_p0, %p560_p9 }
 0x25e   : > { %570 = shalt.err (!%p567_p1)
}
 0x25f   : > { %481 = dma.vmem_to_hbm [thread:$0]  (%p687_p4), %s767_s7, 16, %s765_s10, %s318_s11  }
 0x260 PF: > { %p487_p2 = scmp.ge.s32.totalorder %s621_s17, 2  ;;  %s342_s4 = sand.u32 1, %s601_s12  }
 0x261   : > { %s343_s5 = scalar_lea.sflag [#allocation4], %s342_s4 }
 0x262   : > { %p484_p3 = pnand %p487_p2, %p694_p8 }
 0x264   : > { %596 = dma.done.wait (!%p484_p3), %s343_s5, 16  }
 0x265   : > { %598 = vsyncadd (!%p484_p3), %s343_s5, 4294967280  ;;  %s16_s17 = sadd.s32 1, %s621_s17   ;;  %s819_s12 = smov %s605_s13 }
 0x266   : > { %p13_p5 = scmp.ge.s32.totalorder %s16_s17, 4   ;;  %s820_s13 = smov %s609_s14 }
 0x267   : > { %s821_s14 = smov %s700_s25  ;;  %s822_s15 = smov %s617_s16 }
 0x268   : > { %s823_s16 = smov %s825_s20  ;;  %15 = sbr.rel (!%p13_p5) target bundleno = 4 (0x4), region = 75 }
 0x26f   :  { %347 = vsyncpa [#allocation4], 1 }
 0x270   :  { %349 = vsyncpa [#allocation4 + $0x1], 1 }

</bundles_post_ra>
